<compile_context>
chip_gen: v7x
topology: tpu7x:2x2x1
jax: 0.10.0
libtpu: 0.0.40
codegen_flags: <defaults>
</compile_context>

<pallas_src>
import functools

import jax
import jax.numpy as jnp
from jax.experimental import pallas as pl
from jax.experimental.pallas import tpu as pltpu


AGG_DTYPE = jnp.bfloat16   # dtype of A_norm and of all inter-layer activations
LANE = 128


def _round_up(x, m):
    return (x + m - 1) // m * m


def _largest_aligned_divisor(n_pad, cap, min_blocks=1):
    """Largest multiple of LANE dividing n_pad, <= cap, leaving >= min_blocks blocks."""
    best = LANE
    d = LANE
    while d <= n_pad:
        if n_pad % d == 0 and d <= cap and n_pad // d >= min_blocks:
            best = d
        d += LANE
    return best


def _tiles_for(n):
    """Pick (n_pad, tm, tk, big_vmem) with tm/tk 128-aligned divisors of n_pad."""
    big_vmem = False
    try:  # 128 MiB VMEM parts (v5e/v6e) can take much larger tiles than v7x (64 MiB)
        big_vmem = getattr(pltpu.get_tpu_info(), "vmem_capacity_bytes", 0) >= 96 * 1024 * 1024
    except Exception:
        pass
    tm_max, tk_max = (2048, 4096) if big_vmem else (1024, 2048)

    n_pad = _round_up(n, LANE)
    if n_pad > 1024:
        # Modest rounding (512) keeps the O(N^2) A_norm stream close to minimal
        # while guaranteeing a rich set of 128-aligned divisors for the tiles.
        n_pad = _round_up(n_pad, 512)

    # Keep >= 2 row blocks (when possible) so the "parallel" row axis can split
    # across v7x's two TensorCores; harmless on single-TC v5e/v6e.
    tm = _largest_aligned_divisor(n_pad, tm_max, min_blocks=2)
    tk = _largest_aligned_divisor(n_pad, tk_max, min_blocks=1)
    return n_pad, tm, tk, big_vmem


def _pad2(a, rows, cols):
    a = jnp.asarray(a, jnp.float32)
    return jnp.pad(a, ((0, rows - a.shape[0]), (0, cols - a.shape[1])))


# ---------------------------------------------------------------------------
# Kernels
# ---------------------------------------------------------------------------

def _sage_epilogue(agg, x_self, w_ref, b_ref, d_in):
    """relu(l2norm(agg @ Wl + b + x_self @ Wr)) with W = [Wl; Wr] stacked on rows."""
    out = jnp.dot(agg, w_ref[0:d_in, :], preferred_element_type=jnp.float32)
    out = out + jnp.dot(x_self, w_ref[d_in:2 * d_in, :],
                        preferred_element_type=jnp.float32)
    out = out + b_ref[...]
    # F.normalize(out, p=2, dim=-1), eps=1e-12  ==  out * rsqrt(max(sum(out^2), 1e-24))
    ssq = jnp.sum(out * out, axis=-1, keepdims=True)
    out = out * jax.lax.rsqrt(jnp.maximum(ssq, 1e-24))
    return jnp.maximum(out, 0.0)                   # ReLU (Dropout identity in eval mode)


def _sage_layer_kernel(a_ref, xk_ref, xi_ref, w_ref, b_ref, o_ref, agg_ref, *, d_in):
    """grid = (n_pad//tm, n_pad//tk); axis 0 'parallel', axis 1 reduction ('arbitrary')."""
    k = pl.program_id(1)

    @pl.when(k == 0)
    def _():
        agg_ref[...] = jnp.zeros_like(agg_ref)

    # mean-aggregation partial sum: bf16 x bf16 MXU matmul, f32 accumulate.
    agg_ref[...] += jnp.dot(a_ref[...], xk_ref[...],
                            preferred_element_type=jnp.float32)

    @pl.when(k == pl.num_programs(1) - 1)
    def _():
        o_ref[...] = _sage_epilogue(agg_ref[...], xi_ref[...], w_ref, b_ref,
                                    d_in).astype(o_ref.dtype)


def _sage_layer_head_kernel(a_ref, xk_ref, xi_ref, w_ref, b_ref,
                            wi_ref, bi_ref, wc_ref, bc_ref, o_ref, agg_ref, *, d_in):
    """Third SAGE layer with the classifier head fused into its epilogue."""
    k = pl.program_id(1)

    @pl.when(k == 0)
    def _():
        agg_ref[...] = jnp.zeros_like(agg_ref)

    agg_ref[...] += jnp.dot(a_ref[...], xk_ref[...],
                            preferred_element_type=jnp.float32)

    @pl.when(k == pl.num_programs(1) - 1)
    def _():
        h = _sage_epilogue(agg_ref[...], xi_ref[...], w_ref, b_ref, d_in)
        # head: relu(integration_linear(h)) -> classifier  (lane-dense 128-wide out)
        h = jnp.maximum(
            jnp.dot(h, wi_ref[...], preferred_element_type=jnp.float32) + bi_ref[...],
            0.0)
        o_ref[...] = (jnp.dot(h, wc_ref[...], preferred_element_type=jnp.float32)
                      + bc_ref[...]).astype(o_ref.dtype)


# ---------------------------------------------------------------------------
# pallas_call wrappers
# ---------------------------------------------------------------------------

def _compiler_params(big_vmem):
    return pltpu.CompilerParams(
        dimension_semantics=("parallel", "arbitrary"),
        vmem_limit_bytes=(96 if big_vmem else 32) * 1024 * 1024,
    )


def _a_spec(tm, tk, n_steps):
    """BlockSpec for the A_norm stream; 3-deep buffering when the grid is big enough."""
    index_map = lambda i, k: (i, k)
    if n_steps >= 4:
        try:
            return pl.BlockSpec((tm, tk), index_map, pipeline_mode=pl.Buffered(3))
        except Exception:
            pass
    return pl.BlockSpec((tm, tk), index_map)


def _sage_layer(a_norm, x, w, b, tm, tk, big_vmem):
    n_pad = a_norm.shape[0]
    d_in, d_out = x.shape[1], w.shape[1]
    grid = (n_pad // tm, n_pad // tk)
    return pl.pallas_call(
        functools.partial(_sage_layer_kernel, d_in=d_in),
        out_shape=jax.ShapeDtypeStruct((n_pad, d_out), AGG_DTYPE),  # bf16 inter-layer stream
        grid_spec=pltpu.PrefetchScalarGridSpec(
            num_scalar_prefetch=0,
            grid=grid,
            in_specs=[
                _a_spec(tm, tk, grid[0] * grid[1]),                    # A_norm (bf16)
                pl.BlockSpec((tk, d_in), lambda i, k: (k, 0)),         # X k-rows (aggregation)
                pl.BlockSpec((tm, d_in), lambda i, k: (i, 0)),         # X i-rows (self branch)
                pl.BlockSpec((2 * d_in, d_out), lambda i, k: (0, 0)),  # [Wl; Wr] stacked
                pl.BlockSpec((1, d_out), lambda i, k: (0, 0)),         # bias
            ],
            out_specs=pl.BlockSpec((tm, d_out), lambda i, k: (i, 0)),
            scratch_shapes=[pltpu.VMEM((tm, d_in), jnp.float32)],
        ),
        compiler_params=_compiler_params(big_vmem),
    )(a_norm, x, x, w, b)


def _sage_layer_with_head(a_norm, x, w, b, w_int, b_int, w_cls, b_cls, tm, tk, big_vmem):
    n_pad = a_norm.shape[0]
    d_in, d_mid, d_cls = x.shape[1], w.shape[1], w_cls.shape[1]
    grid = (n_pad // tm, n_pad // tk)
    return pl.pallas_call(
        functools.partial(_sage_layer_head_kernel, d_in=d_in),
        out_shape=jax.ShapeDtypeStruct((n_pad, d_cls), jnp.float32),
        grid_spec=pltpu.PrefetchScalarGridSpec(
            num_scalar_prefetch=0,
            grid=grid,
            in_specs=[
                _a_spec(tm, tk, grid[0] * grid[1]),
                pl.BlockSpec((tk, d_in), lambda i, k: (k, 0)),
                pl.BlockSpec((tm, d_in), lambda i, k: (i, 0)),
                pl.BlockSpec((2 * d_in, d_mid), lambda i, k: (0, 0)),
                pl.BlockSpec((1, d_mid), lambda i, k: (0, 0)),
                pl.BlockSpec((d_mid, d_mid), lambda i, k: (0, 0)),     # w_int
                pl.BlockSpec((1, d_mid), lambda i, k: (0, 0)),         # b_int
                pl.BlockSpec((d_mid, d_cls), lambda i, k: (0, 0)),     # w_cls (128-wide pad)
                pl.BlockSpec((1, d_cls), lambda i, k: (0, 0)),         # b_cls
            ],
            out_specs=pl.BlockSpec((tm, d_cls), lambda i, k: (i, 0)),
            scratch_shapes=[pltpu.VMEM((tm, d_in), jnp.float32)],
        ),
        compiler_params=_compiler_params(big_vmem),
    )(a_norm, x, x, w, b, w_int, b_int, w_cls, b_cls)


# ---------------------------------------------------------------------------
# Plain-JAX glue: adjacency, parameter packing, forward
# ---------------------------------------------------------------------------

def build_norm_adjacency(edge_index, num_nodes_pad):
    """Dense row-normalized adjacency in bf16: A[i, j] = multiplicity(j->i) / deg_in(i)."""
    # TODO(synk): replace this dense O(N^2) aggregation with a CSR segment-mean
    # (row ptrs + neighbor ids prefetched to SMEM via PrefetchScalarGridSpec).
    src, dst = edge_index[0], edge_index[1]
    # O(E) in-degree (counts edge multiplicity, matching scatter-mean semantics).
    deg = jnp.zeros((num_nodes_pad,), jnp.float32).at[dst].add(1.0)
    inv_deg = jnp.where(deg > 0.0, 1.0 / deg, 0.0)
    # Single O(N^2) HBM pass: scatter 1/deg[dst] directly into a bf16 buffer.
    adj = jnp.zeros((num_nodes_pad, num_nodes_pad), AGG_DTYPE)
    return adj.at[dst, src].add(inv_deg[dst].astype(AGG_DTYPE))


def sage_classifier_forward(x, edge_index, params):
    """Forward pass of SAGEClassifier in eval mode."""
    n, d_in = x.shape
    n_pad, tm, tk, big_vmem = _tiles_for(n)
    a_norm = build_norm_adjacency(edge_index, n_pad)

    # bf16 activations end-to-end (cast once here; layers emit bf16 directly).
    x_p = _pad2(x, n_pad, _round_up(d_in, LANE)).astype(AGG_DTYPE)
    h = _sage_layer(a_norm, x_p, params["w1"], params["b1"], tm, tk, big_vmem)
    h = _sage_layer(a_norm, h, params["w2"], params["b2"], tm, tk, big_vmem)
    out = _sage_layer_with_head(a_norm, h, params["w3"], params["b3"],
                                params["w_int"], params["b_int"],
                                params["w_cls"], params["b_cls"], tm, tk, big_vmem)
    return out[:n, :params["output_dim"]]


def init_raw_params(key, input_dim, hidden_dim, integration_dim, output_dim):
    """Deterministic synthetic parameters (weights stored as [in, out])."""
    ks = jax.random.split(key, 12)

    def w(k, din, dout):
        return jax.random.normal(k, (din, dout), jnp.float32) / jnp.sqrt(din)

    def b(k, dout):
        return 0.01 * jax.random.normal(k, (dout,), jnp.float32)

    return {
        "w1_l": w(ks[0], input_dim, hidden_dim), "b1_l": b(ks[1], hidden_dim),
        "w1_r": w(ks[2], input_dim, hidden_dim),
        "w2_l": w(ks[3], hidden_dim, hidden_dim), "b2_l": b(ks[4], hidden_dim),
        "w2_r": w(ks[5], hidden_dim, hidden_dim),
        "w3_l": w(ks[6], hidden_dim, integration_dim), "b3_l": b(ks[7], integration_dim),
        "w3_r": w(ks[8], hidden_dim, integration_dim),
        "w_int": w(ks[9], integration_dim, integration_dim),
        "b_int": b(ks[10], integration_dim),
        "w_cls": w(ks[11], integration_dim, output_dim),
        "b_cls": jnp.zeros((output_dim,), jnp.float32),
        # TODO(synk): integration_linear2 is declared in __init__ but never used in
        # forward; omitted from the compute path.
    }


def pack_params(raw, input_dim, hidden_dim, integration_dim, output_dim):
    """Zero-pad all feature dims to multiples of 128 and stack [Wl; Wr] per layer."""
    di = _round_up(input_dim, LANE)
    dh = _round_up(hidden_dim, LANE)
    dg = _round_up(integration_dim, LANE)
    do = _round_up(output_dim, LANE)

    def stack(wl, wr, b, dpi, dpo):
        w = jnp.concatenate([_pad2(wl, dpi, dpo), _pad2(wr, dpi, dpo)], axis=0)
        return w, _pad2(b.reshape(1, -1), 1, dpo)

    w1, b1 = stack(raw["w1_l"], raw["w1_r"], raw["b1_l"], di, dh)
    w2, b2 = stack(raw["w2_l"], raw["w2_r"], raw["b2_l"], dh, dh)
    w3, b3 = stack(raw["w3_l"], raw["w3_r"], raw["b3_l"], dh, dg)
    return {
        "w1": w1, "b1": b1, "w2": w2, "b2": b2, "w3": w3, "b3": b3,
        "w_int": _pad2(raw["w_int"], dg, dg),
        "b_int": _pad2(raw["b_int"].reshape(1, -1), 1, dg),
        "w_cls": _pad2(raw["w_cls"], dg, do),
        "b_cls": _pad2(raw["b_cls"].reshape(1, -1), 1, do),
        "output_dim": output_dim,
    }


def reference_forward(x, edge_index, raw):
    """Plain-JAX f32 eval-mode reference for a loose-tolerance check."""
    n = x.shape[0]
    src, dst = edge_index[0], edge_index[1]
    adj = jnp.zeros((n, n), jnp.float32).at[dst, src].add(1.0)
    a_norm = adj / jnp.maximum(adj.sum(axis=1, keepdims=True), 1.0)

    def sage(h, wl, bl, wr):
        out = (a_norm @ h) @ wl + bl + h @ wr
        nrm = jnp.sqrt(jnp.sum(out * out, axis=-1, keepdims=True))
        out = out / jnp.maximum(nrm, 1e-12)
        return jnp.maximum(out, 0.0)

    h = sage(x, raw["w1_l"], raw["b1_l"], raw["w1_r"])
    h = sage(h, raw["w2_l"], raw["b2_l"], raw["w2_r"])
    h = sage(h, raw["w3_l"], raw["b3_l"], raw["w3_r"])
    h = jnp.maximum(h @ raw["w_int"] + raw["b_int"], 0.0)
    return h @ raw["w_cls"] + raw["b_cls"]


if __name__ == "__main__":
    NUM_NODES = 64
    NUM_EDGES = 256
    INPUT_DIM = 16
    HIDDEN_DIM = 32
    INTEGRATION_DIM = 64
    OUTPUT_DIM = 3

    key = jax.random.PRNGKey(0)
    k_x, k_src, k_dst, k_params = jax.random.split(key, 4)

    x = jax.random.normal(k_x, (NUM_NODES, INPUT_DIM), jnp.float32)
    edge_index = jnp.stack([
        jax.random.randint(k_src, (NUM_EDGES,), 0, NUM_NODES, dtype=jnp.int32),
        jax.random.randint(k_dst, (NUM_EDGES,), 0, NUM_NODES, dtype=jnp.int32),
    ], axis=0)  # [2, E], row 0 = src, row 1 = dst

    raw = init_raw_params(k_params, INPUT_DIM, HIDDEN_DIM, INTEGRATION_DIM, OUTPUT_DIM)
    params = pack_params(raw, INPUT_DIM, HIDDEN_DIM, INTEGRATION_DIM, OUTPUT_DIM)

    out = sage_classifier_forward(x, edge_index, params)
    out = jax.block_until_ready(out)
    assert out.shape == (NUM_NODES, OUTPUT_DIM)
    assert bool(jnp.all(jnp.isfinite(out)))

    # loose-tolerance check vs the plain-JAX f32 reference (A_norm + activations in bf16)
    ref = reference_forward(x, edge_index, raw)
    max_err = float(jnp.max(jnp.abs(out - ref)))
    assert max_err < 5e-2, f"max abs error vs reference: {max_err}"

    print("KERNEL_OK")
</pallas_src>

<mosaic_0001>
module attributes {stable_mosaic.version = 11 : i64} {
  func.func @_sage_layer_kernel(%arg0: i32, %arg1: i32, %arg2: memref<128x128xbf16, #tpu.memory_space<vmem>>, %arg3: memref<128x128xbf16, #tpu.memory_space<vmem>>, %arg4: memref<128x128xbf16, #tpu.memory_space<vmem>>, %arg5: memref<256x128xf32, #tpu.memory_space<vmem>>, %arg6: memref<1x128xf32, #tpu.memory_space<vmem>>, %arg7: memref<128x128xbf16, #tpu.memory_space<vmem>>, %arg8: memref<128x128xf32, #tpu.memory_space<vmem>>) attributes {dimension_semantics = [#tpu.dimension_semantics<parallel>, #tpu.dimension_semantics<arbitrary>], iteration_bounds = array<i64: 1, 1>, scalar_prefetch = 0 : i64, scratch_operands = 1 : i64, tpu.core_type = #tpu.core_type<tc>, window_params = [{transform_indices = @transform_0, window_bounds = array<i64: 128, 128>}, {transform_indices = @transform_1, window_bounds = array<i64: 128, 128>}, {transform_indices = @transform_2, window_bounds = array<i64: 128, 128>}, {pipeline_mode = #tpu.pipeline_mode<synchronous>, transform_indices = @transform_3, window_bounds = array<i64: 256, 128>}, {pipeline_mode = #tpu.pipeline_mode<synchronous>, transform_indices = @transform_4, window_bounds = array<i64: 1, 128>}, {transform_indices = @transform_5, window_bounds = array<i64: 128, 128>}]} {
    %c0_i32 = arith.constant 0 : i32
    %0 = arith.cmpi eq, %arg1, %c0_i32 : i32
    %1 = arith.extui %0 : i1 to i32
    %c0_i32_0 = arith.constant 0 : i32
    %2 = arith.cmpi ne, %1, %c0_i32_0 : i32
    scf.if %2 {
      %cst_10 = arith.constant 0.000000e+00 : f32
      %12 = vector.broadcast %cst_10 : f32 to vector<128x128xf32>
      %c0_11 = arith.constant 0 : index
      %c0_12 = arith.constant 0 : index
      %13 = vector.load %arg8[%c0_11, %c0_12] : memref<128x128xf32, #tpu.memory_space<vmem>>, vector<128x128xf32>
      tpu.vector_store %arg8[%c0_11, %c0_12], %12 {strides = array<i32>} : memref<128x128xf32, #tpu.memory_space<vmem>>, vector<128x128xf32>,
    } else {
    }
    %c0 = arith.constant 0 : index
    %c0_1 = arith.constant 0 : index
    %3 = vector.load %arg8[%c0, %c0_1] : memref<128x128xf32, #tpu.memory_space<vmem>>, vector<128x128xf32>
    %c0_2 = arith.constant 0 : index
    %c0_3 = arith.constant 0 : index
    %4 = vector.load %arg2[%c0_2, %c0_3] : memref<128x128xbf16, #tpu.memory_space<vmem>>, vector<128x128xbf16>
    %c0_4 = arith.constant 0 : index
    %c0_5 = arith.constant 0 : index
    %5 = vector.load %arg3[%c0_4, %c0_5] : memref<128x128xbf16, #tpu.memory_space<vmem>>, vector<128x128xbf16>
    %cst = arith.constant dense<0.000000e+00> : vector<128x128xf32>
    %6 = tpu.matmul %4, %5, %cst {dimension_numbers = #tpu.dot_dimension_numbers<[1], [0], [0], [1], [0, 0, 1, 1], [], []>} : vector<128x128xbf16>, vector<128x128xbf16>, vector<128x128xf32> -> vector<128x128xf32>
    %7 = arith.addf %3, %6 : vector<128x128xf32>
    %c0_6 = arith.constant 0 : index
    %c0_7 = arith.constant 0 : index
    %8 = vector.load %arg8[%c0_6, %c0_7] : memref<128x128xf32, #tpu.memory_space<vmem>>, vector<128x128xf32>
    tpu.vector_store %arg8[%c0_6, %c0_7], %7 {strides = array<i32>} : memref<128x128xf32, #tpu.memory_space<vmem>>, vector<128x128xf32>,
    %c0_i32_8 = arith.constant 0 : i32
    %9 = arith.cmpi eq, %arg1, %c0_i32_8 : i32
    %10 = arith.extui %9 : i1 to i32
    %c0_i32_9 = arith.constant 0 : i32
    %11 = arith.cmpi ne, %10, %c0_i32_9 : i32
    scf.if %11 {
      %c0_10 = arith.constant 0 : index
      %c0_11 = arith.constant 0 : index
      %12 = vector.load %arg8[%c0_10, %c0_11] : memref<128x128xf32, #tpu.memory_space<vmem>>, vector<128x128xf32>
      %c0_12 = arith.constant 0 : index
      %c0_13 = arith.constant 0 : index
      %13 = vector.load %arg4[%c0_12, %c0_13] : memref<128x128xbf16, #tpu.memory_space<vmem>>, vector<128x128xbf16>
      %c0_14 = arith.constant 0 : index
      %c0_15 = arith.constant 0 : index
      %14 = vector.load %arg5[%c0_14, %c0_15] : memref<256x128xf32, #tpu.memory_space<vmem>>, vector<128x128xf32>
      %cst_16 = arith.constant dense<0.000000e+00> : vector<128x128xf32>
      %15 = tpu.matmul %12, %14, %cst_16 {dimension_numbers = #tpu.dot_dimension_numbers<[1], [0], [0], [1], [0, 0, 1, 1], [], []>} : vector<128x128xf32>, vector<128x128xf32>, vector<128x128xf32> -> vector<128x128xf32>
      %c128 = arith.constant 128 : index
      %c0_17 = arith.constant 0 : index
      %16 = vector.load %arg5[%c128, %c0_17] : memref<256x128xf32, #tpu.memory_space<vmem>>, vector<128x128xf32>
      %cst_18 = arith.constant dense<0.000000e+00> : vector<128x128xf32>
      %17 = tpu.matmul %13, %16, %cst_18 {dimension_numbers = #tpu.dot_dimension_numbers<[1], [0], [0], [1], [0, 0, 1, 1], [], []>} : vector<128x128xbf16>, vector<128x128xf32>, vector<128x128xf32> -> vector<128x128xf32>
      %18 = arith.addf %15, %17 : vector<128x128xf32>
      %c0_19 = arith.constant 0 : index
      %c0_20 = arith.constant 0 : index
      %19 = vector.load %arg6[%c0_19, %c0_20] : memref<1x128xf32, #tpu.memory_space<vmem>>, vector<1x128xf32>
      %20 = vector.broadcast %19 : vector<1x128xf32> to vector<128x128xf32>
      %21 = arith.addf %18, %20 : vector<128x128xf32>
      %22 = arith.mulf %21, %21 : vector<128x128xf32>
      %cst_21 = arith.constant dense<0.000000e+00> : vector<128xf32>
      %23 = vector.multi_reduction <add>, %22, %cst_21 [1] : vector<128x128xf32> to vector<128xf32>
      %24 = vector.shape_cast %23 : vector<128xf32> to vector<128x1xf32>
      %cst_22 = arith.constant 1.000000e-24 : f32
      %25 = vector.broadcast %cst_22 : f32 to vector<128x1xf32>
      %26 = arith.maximumf %24, %25 : vector<128x1xf32>
      %27 = math.rsqrt %26 : vector<128x1xf32>
      %28 = vector.broadcast %27 : vector<128x1xf32> to vector<128x128xf32>
      %29 = arith.mulf %21, %28 : vector<128x128xf32>
      %cst_23 = arith.constant 0.000000e+00 : f32
      %30 = vector.broadcast %cst_23 : f32 to vector<128x128xf32>
      %31 = arith.maximumf %29, %30 : vector<128x128xf32>
      %32 = arith.truncf %31 : vector<128x128xf32> to vector<128x128xbf16>
      %c0_24 = arith.constant 0 : index
      %c0_25 = arith.constant 0 : index
      %33 = vector.load %arg7[%c0_24, %c0_25] : memref<128x128xbf16, #tpu.memory_space<vmem>>, vector<128x128xbf16>
      tpu.vector_store %arg7[%c0_24, %c0_25], %32 {strides = array<i32>} : memref<128x128xbf16, #tpu.memory_space<vmem>>, vector<128x128xbf16>,
    } else {
    }
    return
  }
  func.func @transform_0(%arg0: i32, %arg1: i32) -> (i32, i32) {
    %c0_i32 = arith.constant 0 : i32
    return %arg0, %arg1 : i32, i32
  }
  func.func @transform_1(%arg0: i32, %arg1: i32) -> (i32, i32) {
    %c0_i32 = arith.constant 0 : i32
    %c0_i32_0 = arith.constant 0 : i32
    return %arg1, %c0_i32 : i32, i32
  }
  func.func @transform_2(%arg0: i32, %arg1: i32) -> (i32, i32) {
    %c0_i32 = arith.constant 0 : i32
    %c0_i32_0 = arith.constant 0 : i32
    return %arg0, %c0_i32 : i32, i32
  }
  func.func @transform_3(%arg0: i32, %arg1: i32) -> (i32, i32) {
    %c0_i32 = arith.constant 0 : i32
    %c0_i32_0 = arith.constant 0 : i32
    %c0_i32_1 = arith.constant 0 : i32
    return %c0_i32, %c0_i32_0 : i32, i32
  }
  func.func @transform_4(%arg0: i32, %arg1: i32) -> (i32, i32) {
    %c0_i32 = arith.constant 0 : i32
    %c0_i32_0 = arith.constant 0 : i32
    %c0_i32_1 = arith.constant 0 : i32
    return %c0_i32, %c0_i32_0 : i32, i32
  }
  func.func @transform_5(%arg0: i32, %arg1: i32) -> (i32, i32) {
    %c0_i32 = arith.constant 0 : i32
    %c0_i32_0 = arith.constant 0 : i32
    return %arg0, %c0_i32 : i32, i32
  }
}

</mosaic_0001>

<bundles_post_ra>
// kernel: tpu_custom_call.1
= control target key start
LH: loop header
LB: loop body
LE: loop exit
PB: predicated region body
PF: predicated region fallthrough
CT: control target
= control target key end

     0   :  { %10 = vsyncpa [#allocation4], 0  ;;  %s1806_s0 = inlined_call_operand.hbm [shape: bf16[128,128], index: 0, kind: input, shape index: {}]   ;;  %s1807_s1 = inlined_call_operand.hbm [shape: bf16[128,128], index: 1, kind: input, shape index: {}]   ;;  %s1808_s2 = inlined_call_operand.hbm [shape: bf16[128,128], index: 2, kind: input, shape index: {}]   ;;  %s1809_s3 = inlined_call_operand.hbm [shape: f32[256,128], index: 3, kind: input, shape index: {}]   ;;  %s1810_s4 = inlined_call_operand.vmem [shape: f32[1,128], index: 4, kind: input, shape index: {}]   ;;  %s1811_s5 = inlined_call_operand.hbm [shape: bf16[128,128], index: 5, kind: output, shape index: {}]  }
   0x1   :  { %11 = vsyncpa [#allocation7], 0 }
   0x2   :  { %12 = vsyncpa [#allocation10], 0 }
   0x3   :  { %13 = vsyncpa [#allocation5], 0  ;;  %s1568_s18 = smov [#allocation6]   ;;  %s1569_s20 = smov [#allocation3]  }
   0x4   :  { %s31_s19 = sshll.u32 %s1568_s18, 4  ;;  %s19_s21 = sshll.u32 %s1569_s20, 4  ;;  %s32_s19 = int_to_ptr.vmem [resolvable:$true] %s31_s19  ;;  %s1607_s21 = int_to_ptr.vmem [resolvable:$true] %s19_s21 }
   0x5   :  { %s1450_s24 = scalar_lea.hbm %s1807_s1, 1024 }
   0x6   :  { %p1451_p0 = scmp.ne.s32.totalorder %s1807_s1, %s1450_s24  ;;  %p1454_p1 = scmp.lt.u32.totalorder %s1450_s24, %s1807_s1 }
   0x8   :  { %p1456_p2 = pnand %p1454_p1, %p1451_p0 }
   0xa   :  { %1459 = shalt.err (!%p1456_p2)
}
   0xb   :  { %s1460_s29 = scalar_lea.vmem %s32_s19, 1024  ;;  %p1465_p4 = scmp.lt.s32.totalorder %s32_s19, %s32_s19 }
   0xc   :  { %p1461_p3 = scmp.ne.s32.totalorder %s32_s19, %s1460_s29  ;;  %p1466_p5 = scmp.lt.s32.totalorder %s1460_s29, %s1460_s29 }
   0xe   :  { %p1467_p6 = por %p1466_p5, %p1465_p4 }
  0x10   :  { %p1468_p7 = pnand %p1467_p6, %p1461_p3 }
  0x12   :  { %1471 = shalt.err (!%p1468_p7)
}
  0x13   :  { %s1570_s30 = smov 64   ;;  %s1571_s6 = smov 4  }
  0x14   :  { %37 = dma.hbm_to_vmem [thread:$0]  %s1807_s1, 1024, %s32_s19, [#allocation7], %s1570_s30, %s1570_s30, %s1571_s6  }
  0x15   :  { %s1472_s11 = scalar_lea.hbm %s1806_s0, 1024 }
  0x16   :  { %p1473_p8 = scmp.ne.s32.totalorder %s1806_s0, %s1472_s11  ;;  %p1476_p9 = scmp.lt.u32.totalorder %s1472_s11, %s1806_s0 }
  0x18   :  { %p1478_p10 = pnand %p1476_p9, %p1473_p8 }
  0x1a   :  { %1481 = shalt.err (!%p1478_p10)
}
  0x1b   :  { %s1482_s16 = scalar_lea.vmem %s1607_s21, 1024  ;;  %p1487_p12 = scmp.lt.s32.totalorder %s1607_s21, %s1607_s21 }
  0x1c   :  { %p1483_p11 = scmp.ne.s32.totalorder %s1607_s21, %s1482_s16  ;;  %p1488_p13 = scmp.lt.s32.totalorder %s1482_s16, %s1482_s16 }
  0x1e   :  { %p1489_p0 = por %p1488_p13, %p1487_p12 }
  0x20   :  { %p1490_p1 = pnand %p1489_p0, %p1483_p11 }
  0x22   :  { %1493 = shalt.err (!%p1490_p1)
}
  0x23   :  { %25 = dma.hbm_to_vmem [thread:$0]  %s1806_s0, 1024, %s1607_s21, [#allocation4], %s1570_s30, %s1570_s30, %s1571_s6  }
  0x24   :  { %s1572_s18 = smov [#allocation8]   ;;  %s1573_s20 = smov [#allocation9]  }
  0x25   :  { %s43_s19 = sshll.u32 %s1572_s18, 4  ;;  %s55_s22 = sshll.u32 %s1573_s20, 4  ;;  %s44_s19 = int_to_ptr.vmem [resolvable:$true] %s43_s19  ;;  %s1644_s22 = int_to_ptr.vmem [resolvable:$true] %s55_s22 }
  0x26   :  { %s1494_s25 = scalar_lea.hbm %s1808_s2, 1024 }
  0x27   :  { %p1495_p2 = scmp.ne.s32.totalorder %s1808_s2, %s1494_s25  ;;  %p1498_p3 = scmp.lt.u32.totalorder %s1494_s25, %s1808_s2 }
  0x29   :  { %p1500_p4 = pnand %p1498_p3, %p1495_p2 }
  0x2b   :  { %1503 = shalt.err (!%p1500_p4)
}
  0x2c   :  { %s1504_s0 = scalar_lea.vmem %s44_s19, 1024  ;;  %p1509_p6 = scmp.lt.s32.totalorder %s44_s19, %s44_s19 }
  0x2d   :  { %p1505_p5 = scmp.ne.s32.totalorder %s44_s19, %s1504_s0  ;;  %p1510_p7 = scmp.lt.s32.totalorder %s1504_s0, %s1504_s0 }
  0x2f   :  { %p1511_p8 = por %p1510_p7, %p1509_p6 }
  0x31   :  { %p1512_p9 = pnand %p1511_p8, %p1505_p5 }
  0x33   :  { %1515 = shalt.err (!%p1512_p9)
}
  0x34   :  { %49 = dma.hbm_to_vmem [thread:$0]  %s1808_s2, 1024, %s44_s19, [#allocation7], %s1570_s30, %s1570_s30, %s1571_s6  }
  0x35   :  { %s1516_s10 = scalar_lea.hbm %s1809_s3, 4096 }
  0x36   :  { %p1517_p10 = scmp.ne.s32.totalorder %s1809_s3, %s1516_s10  ;;  %p1520_p11 = scmp.lt.u32.totalorder %s1516_s10, %s1809_s3 }
  0x38   :  { %p1522_p12 = pnand %p1520_p11, %p1517_p10 }
  0x3a   :  { %1525 = shalt.err (!%p1522_p12)
}
  0x3b   :  { %s1526_s15 = scalar_lea.vmem %s1644_s22, 4096  ;;  %p1531_p0 = scmp.lt.s32.totalorder %s1644_s22, %s1644_s22 }
  0x3c   :  { %p1527_p13 = scmp.ne.s32.totalorder %s1644_s22, %s1526_s15  ;;  %p1532_p1 = scmp.lt.s32.totalorder %s1526_s15, %s1526_s15 }
  0x3e   :  { %p1533_p2 = por %p1532_p1, %p1531_p0 }
  0x40   :  { %p1534_p3 = pnand %p1533_p2, %p1527_p13 }
  0x42   :  { %1537 = shalt.err (!%p1534_p3)
}
  0x43   :  { %s1574_s2 = smov 128   ;;  %s1575_s16 = smov 8  }
  0x44   :  { %61 = dma.hbm_to_vmem [thread:$0]  %s1809_s3, 4096, %s1644_s22, [#allocation10], %s1574_s2, %s1574_s2, %s1575_s16  }
  0x45   :  { %1560 = dma.done.wait [#allocation4], 1024  }
  0x46   :  { %1561 = vsyncadd [#allocation4], 4294966272 }
  0x47   :  { %1562 = dma.done.wait [#allocation7], 2048  }
  0x48   :  { %1563 = vsyncadd [#allocation7], 4294965248 }
  0x49   :  { %1564 = dma.done.wait [#allocation10], 4096  }
  0x4a   :  { %1565 = vsyncadd [#allocation10], 4294963200  ;;  %v1394_v0 = vld [vmem:[#allocation6] sm:$0xff]   ;;  %v1395_v1 = vld [vmem:[#allocation6 + $0x8] sm:$0xff]  }
  0x4b   :  { %1169 = vmatprep.subr.bf16.mxu0 %v1394_v0  ;;  %v1396_v2 = vld [vmem:[#allocation6 + $0x10] sm:$0xff]   ;;  %v1397_v3 = vld [vmem:[#allocation6 + $0x18] sm:$0xff]   ;;  %v1402_v4 = vld [vmem:[#allocation3] sm:$0xff]  }
  0x4c   :  { %1170 = vmatpush3.bf16.msra.mxu0 %v1394_v0  ;;  %1185 = vmatprep.mubr.bf16.mxu0 %v1402_v4  ;;  %v1398_v5 = vld [vmem:[#allocation6 + $0x20] sm:$0xff]   ;;  %v1399_v6 = vld [vmem:[#allocation6 + $0x28] sm:$0xff]   ;;  %v423_v9 = vld [vmem:[#allocation9 + $0x90] sm:$0xff] }
  0x4d   :  { %1171 = vmatprep.subr.bf16.mxu0 %v1395_v1  ;;  %v421_v7 = vld [vmem:[#allocation9 + $0x80] sm:$0xff]  ;;  %v422_v8 = vld [vmem:[#allocation9 + $0x88] sm:$0xff]  ;;  %v424_v11 = vld [vmem:[#allocation9 + $0x98] sm:$0xff] }
  0x4e   :  { %v1305_v10 = vpack.c.bf16 %v422_v8, %v421_v7  ;;  %v1309_v12 = vpack.c.bf16 %v424_v11, %v423_v9  ;;  %v425_v13 = vld [vmem:[#allocation9 + $0xa0] sm:$0xff]  ;;  %v426_v14 = vld [vmem:[#allocation9 + $0xa8] sm:$0xff]  ;;  %v1400_v15 = vld [vmem:[#allocation6 + $0x30] sm:$0xff]  }
  0x4f   :  { %v1313_v16 = vpack.c.bf16 %v426_v14, %v425_v13  ;;  %v427_v17 = vld [vmem:[#allocation9 + $0xb0] sm:$0xff]  ;;  %v428_v18 = vld [vmem:[#allocation9 + $0xb8] sm:$0xff]  ;;  %v1410_v20 = vld [vmem:[#allocation8] sm:$0xff]  }
  0x50   :  { %1172 = vmatpush3.bf16.msra.mxu0 %v1395_v1  ;;  %1306 = vmatprep.subr.bf16.mxu1 %v1305_v10  ;;  %v1401_v19 = vld [vmem:[#allocation6 + $0x38] sm:$0xff]   ;;  %v1317_v21 = vpack.c.bf16 %v428_v18, %v427_v17  ;;  %v405_v22 = vld [vmem:[#allocation9] sm:$0xff]  ;;  %v406_v23 = vld [vmem:[#allocation9 + $0x8] sm:$0xff] }
  0x51   :  { %1173 = vmatprep.subr.bf16.mxu0 %v1396_v2  ;;  %1308 = vmatpush3.bf16.msra.mxu1 %v1305_v10  ;;  %v429_v24 = vld [vmem:[#allocation9 + $0xc0] sm:$0xff]  ;;  %v430_v25 = vld [vmem:[#allocation9 + $0xc8] sm:$0xff]  ;;  %v1678_v27 = vpack.c.bf16 %v406_v23, %v405_v22  ;;  %v407_v28 = vld [vmem:[#allocation9 + $0x10] sm:$0xff] }
  0x52   :  { %1310 = vmatprep.subr.bf16.mxu1 %v1309_v12  ;;  %1233 = vmatprep.mubr.bf16.mxu1 %v1410_v20  ;;  %v1403_v26 = vld [vmem:[#allocation3 + $0x8] sm:$0xff]   ;;  %v1404_v29 = vld [vmem:[#allocation3 + $0x10] sm:$0xff]   ;;  %v1321_v30 = vpack.c.bf16 %v430_v25, %v429_v24  ;;  %v408_v31 = vld [vmem:[#allocation9 + $0x18] sm:$0xff] }
  0x53   :  { %v431_v32 = vld [vmem:[#allocation9 + $0xd0] sm:$0xff]  ;;  %v432_v33 = vld [vmem:[#allocation9 + $0xd8] sm:$0xff]  ;;  %v1341_v34 = vpack.c.bf16 %v408_v31, %v407_v28  ;;  %v409_v36 = vld [vmem:[#allocation9 + $0x20] sm:$0xff] }
  0x54   :  { %1174 = vmatpush3.bf16.msra.mxu0 %v1396_v2  ;;  %v1325_v35 = vpack.c.bf16 %v432_v33, %v431_v32  ;;  %v410_v37 = vld [vmem:[#allocation9 + $0x28] sm:$0xff]  ;;  %v433_v38 = vld [vmem:[#allocation9 + $0xe0] sm:$0xff]  ;;  %v411_v42 = vld [vmem:[#allocation9 + $0x30] sm:$0xff] }
  0x55   :  { %1175 = vmatprep.subr.bf16.mxu0 %v1397_v3  ;;  %1312 = vmatpush3.bf16.msra.mxu1 %v1309_v12  ;;  %v434_v39 = vld [vmem:[#allocation9 + $0xe8] sm:$0xff]  ;;  %v1345_v40 = vpack.c.bf16 %v410_v37, %v409_v36  ;;  %v412_v43 = vld [vmem:[#allocation9 + $0x38] sm:$0xff]  ;;  %v435_v45 = vld [vmem:[#allocation9 + $0xf0] sm:$0xff] }
  0x56   :  { %1314 = vmatprep.subr.bf16.mxu1 %v1313_v16  ;;  %v1329_v41 = vpack.c.bf16 %v434_v39, %v433_v38  ;;  %v1405_v44 = vld [vmem:[#allocation3 + $0x18] sm:$0xff]   ;;  %v1406_v47 = vld [vmem:[#allocation3 + $0x20] sm:$0xff]   ;;  %v1349_v48 = vpack.c.bf16 %v412_v43, %v411_v42  ;;  %v414_v51 = vld [vmem:[#allocation9 + $0x48] sm:$0xff] }
  0x57   :  { %v436_v46 = vld [vmem:[#allocation9 + $0xf8] sm:$0xff]  ;;  %v413_v50 = vld [vmem:[#allocation9 + $0x40] sm:$0xff]  ;;  %v1407_v53 = vld [vmem:[#allocation3 + $0x28] sm:$0xff]  }
  0x58   :  { %1176 = vmatpush3.bf16.msra.mxu0 %v1397_v3  ;;  %v1333_v49 = vpack.c.bf16 %v436_v46, %v435_v45  ;;  %v1353_v52 = vpack.c.bf16 %v414_v51, %v413_v50  ;;  %v415_v54 = vld [vmem:[#allocation9 + $0x50] sm:$0xff]  ;;  %v416_v55 = vld [vmem:[#allocation9 + $0x58] sm:$0xff]  ;;  %v1411_v57 = vld [vmem:[#allocation8 + $0x8] sm:$0xff]  }
  0x59   :  { %1177 = vmatprep.subr.bf16.mxu0 %v1398_v5  ;;  %1316 = vmatpush3.bf16.msra.mxu1 %v1313_v16  ;;  %v1408_v56 = vld [vmem:[#allocation3 + $0x30] sm:$0xff]   ;;  %v1357_v58 = vpack.c.bf16 %v416_v55, %v415_v54  ;;  %v417_v60 = vld [vmem:[#allocation9 + $0x60] sm:$0xff]  ;;  %v418_v61 = vld [vmem:[#allocation9 + $0x68] sm:$0xff] }
  0x5a   :  { %1318 = vmatprep.subr.bf16.mxu1 %v1317_v21  ;;  %v1412_v59 = vld [vmem:[#allocation8 + $0x10] sm:$0xff]   ;;  %v1361_v62 = vpack.c.bf16 %v418_v61, %v417_v60  ;;  %v1409_v63 = vld [vmem:[#allocation3 + $0x38] sm:$0xff]   ;;  %v1414_v4 = vld [vmem:[#allocation8 + $0x20] sm:$0xff]  }
  0x5b   :  { %v419_v0 = vld [vmem:[#allocation9 + $0x70] sm:$0xff]  ;;  %v420_v1 = vld [vmem:[#allocation9 + $0x78] sm:$0xff] }
  0x5c   :  { %1178 = vmatpush3.bf16.msra.mxu0 %v1398_v5  ;;  %v1413_v2 = vld [vmem:[#allocation8 + $0x18] sm:$0xff]   ;;  %v1365_v3 = vpack.c.bf16 %v420_v1, %v419_v0  ;;  %v1415_v5 = vld [vmem:[#allocation8 + $0x28] sm:$0xff]  }
  0x5d   :  { %1179 = vmatprep.subr.bf16.mxu0 %v1399_v6  ;;  %1320 = vmatpush3.bf16.msra.mxu1 %v1317_v21  ;;  %v1417_v7 = vld [vmem:[#allocation8 + $0x38] sm:$0xff]  }
  0x5e   :  { %1322 = vmatprep.subr.bf16.mxu1 %v1321_v30 }
  0x60   :  { %1180 = vmatpush3.bf16.msra.mxu0 %v1399_v6  ;;  %v1416_v6 = vld [vmem:[#allocation8 + $0x30] sm:$0xff]  }
  0x61   :  { %1181 = vmatprep.subr.bf16.mxu0 %v1400_v15  ;;  %1324 = vmatpush3.bf16.msra.mxu1 %v1321_v30 }
  0x62   :  { %1326 = vmatprep.subr.bf16.mxu1 %v1325_v35 }
  0x64   :  { %1182 = vmatpush3.bf16.msra.mxu0 %v1400_v15 }
  0x65   :  { %1183 = vmatprep.subr.bf16.mxu0 %v1401_v19  ;;  %1328 = vmatpush3.bf16.msra.mxu1 %v1325_v35 }
  0x66   :  { %1330 = vmatprep.subr.bf16.mxu1 %v1329_v41 }
  0x68   :  { %1184 = vmatpush3.bf16.msra.mxu0 %v1401_v19 }
  0x69   :  { %1338 = vmatprep.subr.bf16.mxu0 %v1678_v27  ;;  %1332 = vmatpush3.bf16.msra.mxu1 %v1329_v41  ;;  %v1691_v41 = vld [vmem:[%s1810_s4] ss:$0 sm:$0xff]  ;;  %s1576_s4 = smov [#allocation11]  }
  0x6a   :  { %1334 = vmatprep.subr.bf16.mxu1 %v1333_v49  ;;  %s979_s19 = sshll.u32 %s1576_s4, 4  ;;  %s980_s19 = int_to_ptr.vmem [resolvable:$true] %s979_s19 }
  0x6b   :  { %1186 = vmatmul.mubr.bf16.vlgmr.msra.gmra.mrb[0].mxu0 %v1403_v26  ;;  %s1538_s20 = scalar_lea.vmem %s980_s19, 1024  ;;  %p1543_p5 = scmp.lt.s32.totalorder %s980_s19, %s980_s19 }
  0x6c   :  { %1189 = vmatprep.mubr.bf16.mxu0 %v1404_v29  ;;  %1340 = vmatpush3.bf16.msra.mxu0 %v1678_v27  ;;  %p1539_p4 = scmp.ne.s32.totalorder %s980_s19, %s1538_s20  ;;  %p1544_p6 = scmp.lt.s32.totalorder %s1538_s20, %s1538_s20 }
  0x6d   :  { %1342 = vmatprep.subr.bf16.mxu0 %v1341_v34  ;;  %1336 = vmatpush3.bf16.msra.mxu1 %v1333_v49 }
  0x6e   :  { %1369 = vmatprep.subr.bf16.mxu1 %v1678_v27  ;;  %p1545_p7 = por %p1544_p6, %p1543_p5 }
  0x70   :  { %1344 = vmatpush3.bf16.msra.mxu0 %v1341_v34  ;;  %1234 = vmatmul.mubr.bf16.vlgmr.msra.gmra.mrb[0].mxu1 %v1411_v57  ;;  %p1546_p8 = pnand %p1545_p7, %p1539_p4 }
  0x71   :  { %1346 = vmatprep.subr.bf16.mxu0 %v1345_v40  ;;  %1377 = vmatpush3.bf16.msra.mxu1 %v1678_v27 }
  0x72   :  { %1370 = vmatprep.subr.bf16.mxu1 %v1341_v34  ;;  %1237 = vmatprep.mubr.bf16.mxu1 %v1412_v59 }
  0x73   :  { %1190 = vmatmul.mubr.bf16.gmra.mrb[4].mxu0 %v1405_v44 }
  0x74   :  { %1193 = vmatprep.mubr.bf16.mxu0 %v1406_v47  ;;  %1348 = vmatpush3.bf16.msra.mxu0 %v1345_v40 }
  0x75   :  { %1350 = vmatprep.subr.bf16.mxu0 %v1349_v48  ;;  %1378 = vmatpush3.bf16.msra.mxu1 %v1341_v34 }
  0x76   :  { %1371 = vmatprep.subr.bf16.mxu1 %v1345_v40 }
  0x78   :  { %1352 = vmatpush3.bf16.msra.mxu0 %v1349_v48  ;;  %1238 = vmatmul.mubr.bf16.gmra.mrb[4].mxu1 %v1413_v2 }
  0x79   :  { %1354 = vmatprep.subr.bf16.mxu0 %v1353_v52  ;;  %1379 = vmatpush3.bf16.msra.mxu1 %v1345_v40 }
  0x7a   :  { %1372 = vmatprep.subr.bf16.mxu1 %v1349_v48  ;;  %1241 = vmatprep.mubr.bf16.mxu1 %v1414_v4 }
  0x7b   :  { %1194 = vmatmul.mubr.bf16.gmra.mrb[8].mxu0 %v1407_v53 }
  0x7c   :  { %1197 = vmatprep.mubr.bf16.mxu0 %v1408_v56  ;;  %1356 = vmatpush3.bf16.msra.mxu0 %v1353_v52 }
  0x7d   :  { %1358 = vmatprep.subr.bf16.mxu0 %v1357_v58  ;;  %1380 = vmatpush3.bf16.msra.mxu1 %v1349_v48 }
  0x7e   :  { %1373 = vmatprep.subr.bf16.mxu1 %v1353_v52 }
  0x80   :  { %1360 = vmatpush3.bf16.msra.mxu0 %v1357_v58  ;;  %1242 = vmatmul.mubr.bf16.gmra.mrb[8].mxu1 %v1415_v5 }
  0x81   :  { %1362 = vmatprep.subr.bf16.mxu0 %v1361_v62  ;;  %1381 = vmatpush3.bf16.msra.mxu1 %v1353_v52 }
  0x82   :  { %1374 = vmatprep.subr.bf16.mxu1 %v1357_v58  ;;  %1245 = vmatprep.mubr.bf16.mxu1 %v1416_v6 }
  0x83   :  { %1198 = vmatmul.mubr.bf16.gmra.mrb[12].mxu0 %v1409_v63 }
  0x84   :  { %1364 = vmatpush3.bf16.msra.mxu0 %v1361_v62 }
  0x85   :  { %1366 = vmatprep.subr.bf16.mxu0 %v1365_v3  ;;  %1382 = vmatpush3.bf16.msra.mxu1 %v1357_v58 }
  0x86   :  { %1375 = vmatprep.subr.bf16.mxu1 %v1361_v62 }
  0x88   :  { %1368 = vmatpush3.bf16.msra.mxu0 %v1365_v3  ;;  %1246 = vmatmul.mubr.bf16.gmra.mrb[12].mxu1 %v1417_v7 }
  0x89   :  { %1383 = vmatpush3.bf16.msra.mxu1 %v1361_v62 }
  0x8a   :  { %1376 = vmatprep.subr.bf16.mxu1 %v1365_v3 }
  0x8d   :  { %1384 = vmatpush3.bf16.msra.mxu1 %v1365_v3 }
 0x13e   :  { %v1187_v8 = vpop.f32.mrb[0].mxu0 }
 0x13f   :  { %v275_v9 = vpop.f32.mrb[1].mxu0 }
 0x140   :  { %v1188_v10 = vpop.f32.mrb[2].mxu0  ;;  %1281 = vmatprep.mubr.f32.mxu0 %v275_v9 }
 0x141   :  { %v278_v11 = vpop.f32.mrb[3].mxu0 }
 0x142   :  { %1282 = vmatmul.mubr.f32.vlgmr.msra.gmra.mrb[16].mxu0 %v278_v11 }
 0x143   :  { %1284 = vmatprep.mubr.f32.mxu0 %v1187_v8  ;;  %v1235_v18 = vpop.f32.mrb[0].mxu1 }
 0x144   :  { %v551_v20 = vpop.f32.mrb[1].mxu1 }
 0x145   :  { %v1236_v22 = vpop.f32.mrb[2].mxu1 }
 0x146   :  { %v1191_v12 = vpop.f32.mrb[4].mxu0  ;;  %1285 = vmatmul.mubr.f32.gmra.mrb[18].mxu0 %v1188_v10  ;;  %v554_v23 = vpop.f32.mrb[3].mxu1 }
 0x147   :  { %v291_v13 = vpop.f32.mrb[5].mxu0 }
 0x148   :  { %v1192_v14 = vpop.f32.mrb[6].mxu0  ;;  %1287 = vmatprep.mubr.f32.mxu0 %v291_v13 }
 0x149   :  { %v294_v15 = vpop.f32.mrb[7].mxu0 }
 0x14a   :  { %1288 = vmatmul.mubr.f32.gmra.mrb[20].mxu0 %v294_v15 }
 0x14b   :  { %1290 = vmatprep.mubr.f32.mxu0 %v1191_v12  ;;  %v1239_v26 = vpop.f32.mrb[4].mxu1 }
 0x14c   :  { %v567_v28 = vpop.f32.mrb[5].mxu1 }
 0x14d   :  { %v1240_v30 = vpop.f32.mrb[6].mxu1 }
 0x14e   :  { %v1195_v16 = vpop.f32.mrb[8].mxu0  ;;  %1291 = vmatmul.mubr.f32.gmra.mrb[22].mxu0 %v1192_v14  ;;  %v570_v31 = vpop.f32.mrb[7].mxu1 }
 0x14f   :  { %v307_v17 = vpop.f32.mrb[9].mxu0 }
 0x150   :  { %v1196_v19 = vpop.f32.mrb[10].mxu0  ;;  %1293 = vmatprep.mubr.f32.mxu1 %v307_v17 }
 0x151   :  { %v310_v21 = vpop.f32.mrb[11].mxu0 }
 0x152   :  { %1294 = vmatmul.mubr.f32.vlgmr.msra.gmra.mrb[16].mxu1 %v310_v21 }
 0x153   :  { %1296 = vmatprep.mubr.f32.mxu1 %v1195_v16  ;;  %v1243_v32 = vpop.f32.mrb[8].mxu1 }
 0x154   :  { %v583_v33 = vpop.f32.mrb[9].mxu1 }
 0x155   :  { %v1244_v34 = vpop.f32.mrb[10].mxu1 }
 0x156   :  { %v1199_v24 = vpop.f32.mrb[12].mxu0  ;;  %1297 = vmatmul.mubr.f32.gmra.mrb[18].mxu1 %v1196_v19  ;;  %v586_v35 = vpop.f32.mrb[11].mxu1 }
 0x157   :  { %v323_v25 = vpop.f32.mrb[13].mxu0 }
 0x158   :  { %v1200_v27 = vpop.f32.mrb[14].mxu0  ;;  %1299 = vmatprep.mubr.f32.mxu1 %v323_v25 }
 0x159   :  { %v326_v29 = vpop.f32.mrb[15].mxu0 }
 0x15a   :  { %1300 = vmatmul.mubr.f32.gmra.mrb[20].mxu1 %v326_v29 }
 0x15b   :  { %1302 = vmatprep.mubr.f32.mxu1 %v1199_v24  ;;  %v1684_v36 = vpop.f32.mrb[12].mxu1 }
 0x15c   :  { %v599_v37 = vpop.f32.mrb[13].mxu1 }
 0x15d   :  { %v1686_v38 = vpop.f32.mrb[14].mxu1 }
 0x15e   :  { %1303 = vmatmul.mubr.f32.gmra.mrb[22].mxu1 %v1200_v27  ;;  %v602_v39 = vpop.f32.mrb[15].mxu1 }
 0x215   :  { %v1283_v40 = vpop.f32.mrb[16].mxu0 }
 0x216   :  { %v686_v42 = vadd.f32 %v1283_v40, %v554_v23  ;;  %v680_v43 = vpop.f32.mrb[17].mxu0 }
 0x217   :  { %v681_v44 = vadd.f32 %v680_v43, %v551_v20 }
 0x218   :  { %v1694_v45 = vadd.f32 %v1691_v41, %v686_v42 }
 0x219   :  { %v1286_v46 = vpop.f32.mrb[18].mxu0  ;;  %v1697_v47 = vadd.f32 %v1691_v41, %v681_v44 }
 0x21a   :  { %v696_v48 = vadd.f32 %v1286_v46, %v1236_v22  ;;  %v690_v49 = vpop.f32.mrb[19].mxu0  ;;  %v783_v50 = vmul.f32 %v1694_v45, %v1694_v45 }
 0x21b   :  { %v691_v51 = vadd.f32 %v1235_v18, %v690_v49  ;;  %v782_v58 = vmul.f32 %v1697_v47, %v1697_v47 }
 0x21c   :  { %800 = vadd.xlane.f32.xlu0 %v783_v50  ;;  %v1702_v52 = vadd.f32 %v1691_v41, %v696_v48 }
 0x21d   :  { %v1289_v53 = vpop.f32.mrb[20].mxu0  ;;  %v1705_v54 = vadd.f32 %v1691_v41, %v691_v51 }
 0x21e   :  { %v706_v55 = vadd.f32 %v1289_v53, %v570_v31  ;;  %v700_v56 = vpop.f32.mrb[21].mxu0  ;;  %v785_v57 = vmul.f32 %v1702_v52, %v1702_v52 }
 0x21f   :  { %v701_v59 = vadd.f32 %v700_v56, %v567_v28  ;;  %v784_v1 = vmul.f32 %v1705_v54, %v1705_v54 }
 0x220   :  { %804 = vadd.xlane.f32.xlu1 %v785_v57  ;;  %798 = vadd.xlane.f32.xlu0 %v782_v58  ;;  %v1715_v62 = vadd.f32 %v1691_v41, %v706_v55 }
 0x221   :  { %v1712_v60 = vadd.f32 %v1691_v41, %v701_v59  ;;  %v1292_v61 = vpop.f32.mrb[22].mxu0 }
 0x222   :  { %v716_v63 = vadd.f32 %v1292_v61, %v1240_v30  ;;  %v710_v0 = vpop.f32.mrb[23].mxu0  ;;  %v787_v9 = vmul.f32 %v1715_v62, %v1715_v62 }
 0x223   :  { %v711_v2 = vadd.f32 %v1239_v26, %v710_v0  ;;  %v786_v3 = vmul.f32 %v1712_v60, %v1712_v60 }
 0x224   :  { %802 = vadd.xlane.f32.xlu1 %v784_v1  ;;  %v1725_v6 = vadd.f32 %v1691_v41, %v716_v63 }
 0x225   :  { %v1722_v4 = vadd.f32 %v1691_v41, %v711_v2  ;;  %v1295_v5 = vpop.f32.mrb[16].mxu1  ;;  %806 = vadd.xlane.f32.xlu0 %v786_v3 }
 0x226   :  { %v726_v7 = vadd.f32 %v1295_v5, %v586_v35  ;;  %v720_v8 = vpop.f32.mrb[17].mxu1  ;;  %v789_v17 = vmul.f32 %v1725_v6, %v1725_v6 }
 0x227   :  { %v721_v10 = vadd.f32 %v720_v8, %v583_v33  ;;  %v788_v11 = vmul.f32 %v1722_v4, %v1722_v4 }
 0x228   :  { %808 = vadd.xlane.f32.xlu1 %v787_v9  ;;  %v1735_v14 = vadd.f32 %v1691_v41, %v726_v7 }
 0x229   :  { %v1732_v12 = vadd.f32 %v1691_v41, %v721_v10  ;;  %v1298_v13 = vpop.f32.mrb[18].mxu1  ;;  %810 = vadd.xlane.f32.xlu0 %v788_v11 }
 0x22a   :  { %v736_v15 = vadd.f32 %v1298_v13, %v1244_v34  ;;  %v730_v16 = vpop.f32.mrb[19].mxu1  ;;  %v791_v25 = vmul.f32 %v1735_v14, %v1735_v14 }
 0x22b   :  { %v731_v18 = vadd.f32 %v1243_v32, %v730_v16  ;;  %v790_v19 = vmul.f32 %v1732_v12, %v1732_v12 }
 0x22c   :  { %812 = vadd.xlane.f32.xlu1 %v789_v17  ;;  %v1745_v22 = vadd.f32 %v1691_v41, %v736_v15 }
 0x22d   :  { %v1742_v20 = vadd.f32 %v1691_v41, %v731_v18  ;;  %v1301_v21 = vpop.f32.mrb[20].mxu1  ;;  %814 = vadd.xlane.f32.xlu0 %v790_v19 }
 0x22e   :  { %v746_v23 = vadd.f32 %v1301_v21, %v602_v39  ;;  %v740_v24 = vpop.f32.mrb[21].mxu1  ;;  %v793_v33 = vmul.f32 %v1745_v22, %v1745_v22 }
 0x22f   :  { %v741_v26 = vadd.f32 %v740_v24, %v599_v37  ;;  %v792_v27 = vmul.f32 %v1742_v20, %v1742_v20 }
 0x230   :  { %816 = vadd.xlane.f32.xlu1 %v791_v25  ;;  %v1755_v30 = vadd.f32 %v1691_v41, %v746_v23 }
 0x231   :  { %v1752_v28 = vadd.f32 %v1691_v41, %v741_v26  ;;  %v1304_v29 = vpop.f32.mrb[22].mxu1  ;;  %818 = vadd.xlane.f32.xlu0 %v792_v27 }
 0x232   :  { %v756_v31 = vadd.f32 %v1304_v29, %v1686_v38  ;;  %v750_v32 = vpop.f32.mrb[23].mxu1  ;;  %v795_v38 = vmul.f32 %v1755_v30, %v1755_v30 }
 0x233   :  { %v751_v34 = vadd.f32 %v1684_v36, %v750_v32  ;;  %v794_v35 = vmul.f32 %v1752_v28, %v1752_v28 }
 0x234   :  { %820 = vadd.xlane.f32.xlu1 %v793_v33  ;;  %v1767_v39 = vadd.f32 %v1691_v41, %v756_v31 }
 0x235   :  { %v1764_v37 = vadd.f32 %v1691_v41, %v751_v34  ;;  %822 = vadd.xlane.f32.xlu0 %v794_v35 }
 0x236   :  { %v797_v36 = vmul.f32 %v1767_v39, %v1767_v39 }
 0x237   :  { %v796_v40 = vmul.f32 %v1764_v37, %v1764_v37 }
 0x238   :  { %824 = vadd.xlane.f32.xlu1 %v795_v38 }
 0x239   :  { %826 = vadd.xlane.f32.xlu0 %v796_v40 }
 0x23c   :  { %828 = vadd.xlane.f32.xlu1 %v797_v36 }
 0x2a9   :  { %v801_v42 = vpop.xlane.xlu0 %800 }
 0x2aa   :  { %v831_v43 = vmax.f32 %v801_v42, 1e-24 }
 0x2ac   :  { %1418 = vrsqrt.f32 %v831_v43 }
 0x2ad   :  { %v805_v44 = vpop.xlane.xlu1 %804  ;;  %v799_v46 = vpop.xlane.xlu0 %798 }
 0x2ae   :  { %v833_v48 = vmax.f32 %v805_v44, 1e-24  ;;  %v830_v41 = vmax.f32 %v799_v46, 1e-24 }
 0x2b0   :  { %1420 = vrsqrt.f32 %v833_v48 }
 0x2b1   :  { %1422 = vrsqrt.f32 %v830_v41  ;;  %v803_v49 = vpop.xlane.xlu1 %802 }
 0x2b2   :  { %v832_v50 = vmax.f32 %v803_v49, 1e-24  ;;  %v807_v51 = vpop.xlane.xlu0 %806 }
 0x2b3   :  { %v834_v53 = vmax.f32 %v807_v51, 1e-24 }
 0x2b4   :  { %1424 = vrsqrt.f32 %v832_v50 }
 0x2b5   :  { %1426 = vrsqrt.f32 %v834_v53  ;;  %v809_v55 = vpop.xlane.xlu1 %808 }
 0x2b6   :  { %v835_v56 = vmax.f32 %v809_v55, 1e-24  ;;  %v811_v57 = vpop.xlane.xlu0 %810  ;;  %v1419_v58 = vpop.eup %1418 }
 0x2b7   :  { %v836_v59 = vmax.f32 %v811_v57, 1e-24  ;;  %v863_v0 = vmul.f32 %v1419_v58, %v1694_v45 }
 0x2b8   :  { %1428 = vrsqrt.f32 %v835_v56 }
 0x2b9   :  { %1430 = vrsqrt.f32 %v836_v59  ;;  %v813_v61 = vpop.xlane.xlu1 %812  ;;  %v879_v11 = vmax.f32 %v863_v0, 0.0 }
 0x2ba   :  { %v1421_v63 = vpop.eup %1420  ;;  %v837_v1 = vmax.f32 %v813_v61, 1e-24  ;;  %v815_v2 = vpop.xlane.xlu0 %814 }
 0x2bb   :  { %v1423_v3 = vpop.eup %1422  ;;  %v838_v5 = vmax.f32 %v815_v2, 1e-24  ;;  %v865_v8 = vmul.f32 %v1421_v63, %v1702_v52 }
 0x2bc   :  { %v862_v7 = vmul.f32 %v1423_v3, %v1697_v47  ;;  %1432 = vrsqrt.f32 %v837_v1 }
 0x2bd   :  { %1434 = vrsqrt.f32 %v838_v5  ;;  %v817_v9 = vpop.xlane.xlu1 %816  ;;  %v881_v21 = vmax.f32 %v865_v8, 0.0 }
 0x2be   :  { %v1425_v10 = vpop.eup %1424  ;;  %v878_v13 = vmax.f32 %v862_v7, 0.0  ;;  %v839_v15 = vmax.f32 %v817_v9, 1e-24  ;;  %v819_v16 = vpop.xlane.xlu0 %818 }
 0x2bf   :  { %v1427_v17 = vpop.eup %1426  ;;  %v864_v18 = vmul.f32 %v1425_v10, %v1705_v54  ;;  %v840_v45 = vmax.f32 %v819_v16, 1e-24 }
 0x2c0   :  { %v1053_v19 = vpack.c.bf16 %v879_v11, %v878_v13  ;;  %1436 = vrsqrt.f32 %v839_v15  ;;  %v866_v47 = vmul.f32 %v1427_v17, %v1712_v60 }
 0x2c1   :  { %v880_v23 = vmax.f32 %v864_v18, 0.0  ;;  %1438 = vrsqrt.f32 %v840_v45  ;;  %v821_v24 = vpop.xlane.xlu1 %820 }
 0x2c2   :  { %v1429_v52 = vpop.eup %1428  ;;  %1054 = vst [vmem:[#allocation11] sm:$0xff] %v1053_v19   ;;  %v841_v25 = vmax.f32 %v821_v24, 1e-24  ;;  %v823_v26 = vpop.xlane.xlu0 %822  ;;  %v882_v54 = vmax.f32 %v866_v47, 0.0 }
 0x2c3   :  { %v1431_v27 = vpop.eup %1430  ;;  %v1058_v29 = vpack.c.bf16 %v881_v21, %v880_v23  ;;  %v867_v31 = vmul.f32 %v1429_v52, %v1715_v62  ;;  %v842_v32 = vmax.f32 %v823_v26, 1e-24 }
 0x2c4   :  { %1440 = vrsqrt.f32 %v841_v25  ;;  %v868_v34 = vmul.f32 %v1431_v27, %v1722_v4 }
 0x2c5   :  { %1090 = vst [vmem:[#allocation11 + $0x8] sm:$0xff] %v1058_v29   ;;  %v883_v33 = vmax.f32 %v867_v31, 0.0  ;;  %1442 = vrsqrt.f32 %v842_v32  ;;  %v825_v35 = vpop.xlane.xlu1 %824 }
 0x2c6   :  { %v1433_v60 = vpop.eup %1432  ;;  %v843_v38 = vmax.f32 %v825_v35, 1e-24  ;;  %v827_v40 = vpop.xlane.xlu0 %826  ;;  %v884_v62 = vmax.f32 %v868_v34, 0.0 }
 0x2c7   :  { %v1435_v36 = vpop.eup %1434  ;;  %v1063_v42 = vpack.c.bf16 %v883_v33, %v882_v54  ;;  %v869_v43 = vmul.f32 %v1433_v60, %v1725_v6  ;;  %v844_v44 = vmax.f32 %v827_v40, 1e-24 }
 0x2c8   :  { %1444 = vrsqrt.f32 %v843_v38  ;;  %v870_v48 = vmul.f32 %v1435_v36, %v1732_v12 }
 0x2c9   :  { %1091 = vst [vmem:[#allocation11 + $0x10] sm:$0xff] %v1063_v42   ;;  %v885_v46 = vmax.f32 %v869_v43, 0.0  ;;  %1446 = vrsqrt.f32 %v844_v44  ;;  %v829_v41 = vpop.xlane.xlu1 %828 }
 0x2ca   :  { %v1437_v49 = vpop.eup %1436  ;;  %v845_v4 = vmax.f32 %v829_v41, 1e-24  ;;  %v886_v55 = vmax.f32 %v870_v48, 0.0 }
 0x2cb   :  { %v1439_v50 = vpop.eup %1438  ;;  %v1068_v51 = vpack.c.bf16 %v885_v46, %v884_v62  ;;  %v871_v53 = vmul.f32 %v1437_v49, %v1735_v14 }
 0x2cc   :  { %1448 = vrsqrt.f32 %v845_v4  ;;  %v872_v6 = vmul.f32 %v1439_v50, %v1742_v20 }
 0x2cd   :  { %1092 = vst [vmem:[#allocation11 + $0x18] sm:$0xff] %v1068_v51   ;;  %v887_v56 = vmax.f32 %v871_v53, 0.0 }
 0x2ce   :  { %v1441_v57 = vpop.eup %1440  ;;  %v888_v12 = vmax.f32 %v872_v6, 0.0 }
 0x2cf   :  { %v1443_v58 = vpop.eup %1442  ;;  %v1073_v59 = vpack.c.bf16 %v887_v56, %v886_v55  ;;  %v873_v61 = vmul.f32 %v1441_v57, %v1745_v22 }
 0x2d0   :  { %v874_v0 = vmul.f32 %v1443_v58, %v1752_v28 }
 0x2d1   :  { %1093 = vst [vmem:[#allocation11 + $0x20] sm:$0xff] %v1073_v59   ;;  %v889_v63 = vmax.f32 %v873_v61, 0.0 }
 0x2d2   :  { %v1445_v1 = vpop.eup %1444  ;;  %v890_v5 = vmax.f32 %v874_v0, 0.0 }
 0x2d3   :  { %v1447_v2 = vpop.eup %1446  ;;  %v1078_v3 = vpack.c.bf16 %v889_v63, %v888_v12  ;;  %v875_v14 = vmul.f32 %v1445_v1, %v1755_v30 }
 0x2d4   :  { %v876_v20 = vmul.f32 %v1447_v2, %v1764_v37 }
 0x2d5   :  { %1094 = vst [vmem:[#allocation11 + $0x28] sm:$0xff] %v1078_v3   ;;  %v891_v7 = vmax.f32 %v875_v14, 0.0 }
 0x2d6   :  { %v1449_v8 = vpop.eup %1448  ;;  %v892_v22 = vmax.f32 %v876_v20, 0.0 }
 0x2d7   :  { %v1083_v9 = vpack.c.bf16 %v891_v7, %v890_v5  ;;  %v877_v10 = vmul.f32 %v1449_v8, %v1767_v39 }
 0x2d9   :  { %1095 = vst [vmem:[#allocation11 + $0x30] sm:$0xff] %v1083_v9   ;;  %v893_v11 = vmax.f32 %v877_v10, 0.0 }
 0x2db   :  { %v1088_v28 = vpack.c.bf16 %v893_v11, %v892_v22 }
 0x2dd   :  { %1096 = vst [vmem:[#allocation11 + $0x38] sm:$0xff] %v1088_v28  }
 0x2de   :  { %1549 = shalt.err (!%p1546_p8)
}
 0x2df   :  { %s1550_s24 = scalar_lea.hbm %s1811_s5, 1024 }
 0x2e0   :  { %p1551_p9 = scmp.ne.s32.totalorder %s1811_s5, %s1550_s24  ;;  %p1554_p10 = scmp.lt.u32.totalorder %s1550_s24, %s1811_s5 }
 0x2e2   :  { %p1556_p11 = pnand %p1554_p10, %p1551_p9 }
 0x2e4   :  { %1559 = shalt.err (!%p1556_p11)
}
 0x2e5   :  { %985 = dma.vmem_to_hbm [thread:$0]  %s980_s19, 1024, %s1811_s5, [#allocation5], %s1570_s30, %s1570_s30, %s1571_s6  }
 0x2e6   :  { %1566 = dma.done.wait [#allocation5], 1024  }
 0x2e7   :  { %1567 = vsyncadd [#allocation5], 4294966272 }
 0x2e8   :  { %989 = vsyncpa [#allocation4], 1 }
 0x2e9   :  { %990 = vsyncpa [#allocation7], 1 }
 0x2ea   :  { %991 = vsyncpa [#allocation10], 1 }
 0x2eb   :  { %992 = vsyncpa [#allocation5], 1 }

</bundles_post_ra>
